<compile_context>
chip_gen: v7x
topology: tpu7x:2x2x1
jax: 0.10.0
libtpu: 0.0.40
codegen_flags: <defaults>
</compile_context>

<pallas_src>
import jax
import jax.numpy as jnp
from jax.experimental import pallas as pl
from jax.experimental.pallas import tpu as pltpu

EPS = 1e-6


def add_and_norm_kernel(x_ref, s_ref, g_ref, b_ref, o_ref):
    # x_ref, s_ref, o_ref: (tile_rows, H) ; g_ref, b_ref: (1, H)
    # Statistics are computed in f32 regardless of the I/O dtype.
    y = x_ref[...].astype(jnp.float32) + s_ref[...].astype(jnp.float32)
    h = y.shape[-1]

    # Two-pass mean/variance on the resident tile: numerically robust and still
    # fully hidden under the HBM streams (no MXU use; XLU/VPU have slack).
    mean = jnp.sum(y, axis=-1, keepdims=True) * (1.0 / h)
    d = y - mean
    var = jnp.sum(d * d, axis=-1, keepdims=True) * (1.0 / (h - 1))  # Bessel (torch.std)
    std = jnp.sqrt(var)

    # Per-row reciprocal (tile_rows x 1) + cheap VPU multiplies instead of an
    # H-wide divide per row. approx=False keeps bit-accuracy vs the reference.
    inv = pl.reciprocal(std + EPS, approx=False)

    out = g_ref[...].astype(jnp.float32) * (d * inv) + b_ref[...].astype(jnp.float32)
    o_ref[...] = out.astype(o_ref.dtype)


def _vmem_policy():
    """Generation-aware (budget_bytes, vmem_limit_bytes, two_cores)."""
    try:
        vmem_cap = pltpu.get_tpu_info().vmem_capacity_bytes
    except Exception:
        vmem_cap = 64 << 20  # conservative default (v7x-class)
    if vmem_cap <= (64 << 20):
        # v7x: 64 MiB physical VMEM, 2 TensorCores -> explicit headroom.
        return 40 << 20, 48 << 20, True
    # v5e / v6e: 128 MiB physical VMEM, single TensorCore -> bigger tiles.
    return 64 << 20, 80 << 20, False


def _pick_tile_rows(rows, hidden, itemsize, budget_bytes, two_cores):
    """Largest row tile whose pipelined VMEM footprint stays inside budget."""
    # 3 streams (x, sublayer, out) x 2 pipeline buffers in the I/O dtype, plus
    # ~2 full-tile f32 temporaries (y and d) created by the in-kernel upcast.
    per_row_bytes = 6 * hidden * itemsize + 2 * hidden * 4
    tile = max(8, budget_bytes // per_row_bytes)
    # Keep a few grid steps for DMA pipelining even when VMEM would fit more.
    tile = min(tile, 8192)
    tile = max(8, (tile // 8) * 8)

    if two_cores and rows >= 16:
        # Keep >= 2 grid steps so both v7x TensorCores get work (no-op on
        # v5e/v6e, where the grid is a sequential loop on one core).
        tile = min(tile, ((pl.cdiv(rows, 2) + 7) // 8) * 8)

    if rows < 8:
        return rows  # full-extent block; satisfies the layout rule directly.

    tile = min(tile, rows)
    tile = max(8, (tile // 8) * 8)

    if two_cores and rows > tile:
        # Best-effort: make the step count even so neither TC idles on the
        # last iteration.
        steps = pl.cdiv(rows, tile)
        if steps % 2 == 1:
            steps += 1
            tile = max(8, ((pl.cdiv(rows, steps) + 7) // 8) * 8)
    return tile


def add_and_norm(x, sublayer_out, g, b, *, tile_rows=None):
    """x, sublayer_out: [B, S, H]; g, b: [H]."""
    B, S, H = x.shape
    rows = B * S
    itemsize = jnp.dtype(x.dtype).itemsize

    budget_bytes, vmem_limit_bytes, two_cores = _vmem_policy()
    if tile_rows is None:
        tile_rows = _pick_tile_rows(rows, H, itemsize, budget_bytes, two_cores)

    x2 = x.reshape(rows, H)
    s2 = sublayer_out.reshape(rows, H)
    g2 = g.reshape(1, H)
    b2 = b.reshape(1, H)

    # No padding/copy of inputs or output: the grid may not divide rows evenly;
    # the ragged last block is masked by the pipeline (rows are independent).
    grid_rows = pl.cdiv(rows, tile_rows)

    # Note: H should ideally be a multiple of 128 for lane-dense stores; with
    # H equal to the full array dim the kernel is correct either way.
    out2 = pl.pallas_call(
        add_and_norm_kernel,
        out_shape=jax.ShapeDtypeStruct((rows, H), x.dtype),
        grid_spec=pltpu.PrefetchScalarGridSpec(
            num_scalar_prefetch=0,
            grid=(grid_rows,),
            in_specs=[
                pl.BlockSpec((tile_rows, H), lambda i: (i, 0)),
                pl.BlockSpec((tile_rows, H), lambda i: (i, 0)),
                pl.BlockSpec((1, H), lambda i: (0, 0)),
                pl.BlockSpec((1, H), lambda i: (0, 0)),
            ],
            out_specs=pl.BlockSpec((tile_rows, H), lambda i: (i, 0)),
        ),
        compiler_params=pltpu.CompilerParams(
            dimension_semantics=("parallel",),
            vmem_limit_bytes=vmem_limit_bytes,
        ),
    )(x2, s2, g2, b2)

    return out2.reshape(B, S, H)


def add_and_norm_ref(x, sublayer_out, g, b):
    y = (x + sublayer_out).astype(jnp.float32)
    mean = jnp.mean(y, axis=-1, keepdims=True)
    d = y - mean
    var = jnp.sum(d * d, axis=-1, keepdims=True) / (y.shape[-1] - 1)
    std = jnp.sqrt(var)
    return (g * d / (std + EPS) + b).astype(x.dtype)


if __name__ == "__main__":
    # Small demo shapes; H is a multiple of 128 so the lane axis is dense.
    B, S, H = 2, 8, 128

    key = jax.random.PRNGKey(0)
    kx, ks = jax.random.split(key)
    x = jax.random.normal(kx, (B, S, H), dtype=jnp.float32)
    sub = jax.random.normal(ks, (B, S, H), dtype=jnp.float32)

    # Parameters, initialized per the module's __init__ (g = ones, b = zeros).
    g = jnp.ones((H,), dtype=jnp.float32)
    b = jnp.zeros((H,), dtype=jnp.float32)

    out = add_and_norm(x, sub, g, b)
    out = jax.block_until_ready(out)

    ref = add_and_norm_ref(x, sub, g, b)
    assert jnp.allclose(out, ref, atol=1e-5, rtol=1e-5), "mismatch vs reference"

    print("KERNEL_OK")
</pallas_src>

<mosaic_0001>
module attributes {stable_mosaic.version = 11 : i64} {
  func.func @add_and_norm_kernel(%arg0: i32, %arg1: memref<8x128xf32, #tpu.memory_space<vmem>>, %arg2: memref<8x128xf32, #tpu.memory_space<vmem>>, %arg3: memref<1x128xf32, #tpu.memory_space<vmem>>, %arg4: memref<1x128xf32, #tpu.memory_space<vmem>>, %arg5: memref<8x128xf32, #tpu.memory_space<vmem>>) attributes {dimension_semantics = [#tpu.dimension_semantics<parallel>], iteration_bounds = array<i64: 2>, scalar_prefetch = 0 : i64, scratch_operands = 0 : i64, tpu.core_type = #tpu.core_type<tc>, window_params = [{transform_indices = @transform_0, window_bounds = array<i64: 8, 128>}, {transform_indices = @transform_1, window_bounds = array<i64: 8, 128>}, {pipeline_mode = #tpu.pipeline_mode<synchronous>, transform_indices = @transform_2, window_bounds = array<i64: 1, 128>}, {pipeline_mode = #tpu.pipeline_mode<synchronous>, transform_indices = @transform_3, window_bounds = array<i64: 1, 128>}, {transform_indices = @transform_4, window_bounds = array<i64: 8, 128>}]} {
    %c0 = arith.constant 0 : index
    %c0_0 = arith.constant 0 : index
    %0 = vector.load %arg1[%c0, %c0_0] : memref<8x128xf32, #tpu.memory_space<vmem>>, vector<8x128xf32>
    %c0_1 = arith.constant 0 : index
    %c0_2 = arith.constant 0 : index
    %1 = vector.load %arg2[%c0_1, %c0_2] : memref<8x128xf32, #tpu.memory_space<vmem>>, vector<8x128xf32>
    %2 = arith.addf %0, %1 : vector<8x128xf32>
    %cst = arith.constant dense<0.000000e+00> : vector<8xf32>
    %3 = vector.multi_reduction <add>, %2, %cst [1] : vector<8x128xf32> to vector<8xf32>
    %4 = vector.shape_cast %3 : vector<8xf32> to vector<8x1xf32>
    %cst_3 = arith.constant 7.812500e-03 : f32
    %5 = vector.broadcast %cst_3 : f32 to vector<8x1xf32>
    %6 = arith.mulf %4, %5 : vector<8x1xf32>
    %7 = vector.broadcast %6 : vector<8x1xf32> to vector<8x128xf32>
    %8 = arith.subf %2, %7 : vector<8x128xf32>
    %9 = arith.mulf %8, %8 : vector<8x128xf32>
    %cst_4 = arith.constant dense<0.000000e+00> : vector<8xf32>
    %10 = vector.multi_reduction <add>, %9, %cst_4 [1] : vector<8x128xf32> to vector<8xf32>
    %11 = vector.shape_cast %10 : vector<8xf32> to vector<8x1xf32>
    %cst_5 = arith.constant 0.00787401571 : f32
    %12 = vector.broadcast %cst_5 : f32 to vector<8x1xf32>
    %13 = arith.mulf %11, %12 : vector<8x1xf32>
    %14 = math.sqrt %13 : vector<8x1xf32>
    %cst_6 = arith.constant 9.99999997E-7 : f32
    %15 = vector.broadcast %cst_6 : f32 to vector<8x1xf32>
    %16 = arith.addf %14, %15 : vector<8x1xf32>
    %17 = tpu.reciprocal %16 : vector<8x1xf32> -> vector<8x1xf32>
    %c0_7 = arith.constant 0 : index
    %c0_8 = arith.constant 0 : index
    %18 = vector.load %arg3[%c0_7, %c0_8] : memref<1x128xf32, #tpu.memory_space<vmem>>, vector<1x128xf32>
    %19 = vector.broadcast %17 : vector<8x1xf32> to vector<8x128xf32>
    %20 = arith.mulf %8, %19 : vector<8x128xf32>
    %21 = vector.broadcast %18 : vector<1x128xf32> to vector<8x128xf32>
    %22 = arith.mulf %21, %20 : vector<8x128xf32>
    %c0_9 = arith.constant 0 : index
    %c0_10 = arith.constant 0 : index
    %23 = vector.load %arg4[%c0_9, %c0_10] : memref<1x128xf32, #tpu.memory_space<vmem>>, vector<1x128xf32>
    %24 = vector.broadcast %23 : vector<1x128xf32> to vector<8x128xf32>
    %25 = arith.addf %22, %24 : vector<8x128xf32>
    %c0_11 = arith.constant 0 : index
    %c0_12 = arith.constant 0 : index
    %26 = vector.load %arg5[%c0_11, %c0_12] : memref<8x128xf32, #tpu.memory_space<vmem>>, vector<8x128xf32>
    tpu.vector_store %arg5[%c0_11, %c0_12], %25 {strides = array<i32>} : memref<8x128xf32, #tpu.memory_space<vmem>>, vector<8x128xf32>,
    return
  }
  func.func @transform_0(%arg0: i32) -> (i32, i32) {
    %c0_i32 = arith.constant 0 : i32
    %c0_i32_0 = arith.constant 0 : i32
    return %arg0, %c0_i32 : i32, i32
  }
  func.func @transform_1(%arg0: i32) -> (i32, i32) {
    %c0_i32 = arith.constant 0 : i32
    %c0_i32_0 = arith.constant 0 : i32
    return %arg0, %c0_i32 : i32, i32
  }
  func.func @transform_2(%arg0: i32) -> (i32, i32) {
    %c0_i32 = arith.constant 0 : i32
    %c0_i32_0 = arith.constant 0 : i32
    %c0_i32_1 = arith.constant 0 : i32
    return %c0_i32, %c0_i32_0 : i32, i32
  }
  func.func @transform_3(%arg0: i32) -> (i32, i32) {
    %c0_i32 = arith.constant 0 : i32
    %c0_i32_0 = arith.constant 0 : i32
    %c0_i32_1 = arith.constant 0 : i32
    return %c0_i32, %c0_i32_0 : i32, i32
  }
  func.func @transform_4(%arg0: i32) -> (i32, i32) {
    %c0_i32 = arith.constant 0 : i32
    %c0_i32_0 = arith.constant 0 : i32
    return %arg0, %c0_i32 : i32, i32
  }
}

</mosaic_0001>

<bundles_post_ra>
// kernel: tpu_custom_call.1
= control target key start
LH: loop header
LB: loop body
LE: loop exit
PB: predicated region body
PF: predicated region fallthrough
CT: control target
= control target key end

     0   :  { %9 = vsyncpa [#allocation3], 0  ;;  %s847_s0 = inlined_call_operand.hbm [shape: f32[16,128], index: 0, kind: input, shape index: {}]   ;;  %s848_s1 = inlined_call_operand.hbm [shape: f32[16,128], index: 1, kind: input, shape index: {}]   ;;  %s849_s2 = inlined_call_operand.vmem [shape: f32[1,128], index: 2, kind: input, shape index: {}]   ;;  %s850_s3 = inlined_call_operand.vmem [shape: f32[1,128], index: 3, kind: input, shape index: {}]   ;;  %s851_s4 = inlined_call_operand.hbm [shape: f32[16,128], index: 4, kind: output, shape index: {}]  }
   0x1   :  { %11 = vsyncpa [#allocation3 + $0x1], 0 }
   0x2   :  { %12 = vsyncpa [#allocation6], 0 }
   0x3   :  { %14 = vsyncpa [#allocation6 + $0x1], 0 }
   0x4   :  { %15 = vsyncpa [#allocation4], 0 }
   0x5   :  { %17 = vsyncpa [#allocation4 + $0x1], 0  ;;  %s627_s15 = smov 0   ;;  %s629_s16 = smov 0  }
   0x6   :  { %s631_s17 = smov 0   ;;  %s633_s18 = smov 0  }
   0x7 LB: > { %s648_s19 = sadd.s32 4294967295, %s597_s18   ;;  %s395_s20 = sadd.s32 4294967294, %s597_s18   ;;  %s597_s18 = sphi %s633_s18, %s870_s18   ;;  %s593_s17 = sphi %s631_s17, %s869_s17   ;;  %s589_s16 = sphi %s629_s16, %s868_s16   ;;  %s585_s15 = sphi %s627_s15, %s867_s15  }
   0x8   : > { %s652_s21 = sadd.s32 1, %s597_s18   ;;  %s30_s22 = sadd.s32 1, %s593_s17 }
   0x9   : > { %s27_s23 = ssub.s32 %s597_s18, %s652_s21  ;;  %p37_p0 = scmp.ne.s32.totalorder %s593_s17, %s589_s16 }
   0xa   : > { %p28_p1 = scmp.eq.s32.totalorder %s27_s23, 0  ;;  %p38_p2 = scmp.eq.s32.totalorder %s597_s18, 0 }
   0xb   : > { %p43_p3 = scmp.ne.s32.totalorder %s589_s16, %s585_s15  ;;  %p44_p4 = scmp.eq.s32.totalorder %s648_s19, 0 }
   0xc   : > { %s664_s24 = scalar_select %p28_p1, %s593_s17, %s30_s22  }
   0xd   : > { %p666_p5 = por %p38_p2, %p37_p0  ;;  %p670_p6 = por %p44_p4, %p43_p3 }
   0xe   : > { %p135_p7 = scmp.eq.s32.totalorder %s648_s19, 1  ;;  %p141_p8 = scmp.eq.s32.totalorder %s395_s20, 1 }
   0xf   : > { %s855_s26 = scalar_select %p670_p6, 1, 0 }
  0x10   : > { %p429_p10 = scmp.lt.s32.totalorder %s597_s18, 2  ;;  %p677_p11 = por %p135_p7, %p37_p0 }
  0x11   : > { %p681_p12 = por %p141_p8, %p43_p3  ;;  %s686_s29 = sand.u32 1, %s593_s17  }
  0x12   : > { %s856_s27 = scalar_select %p677_p11, 1, 0 }
  0x13   : > { %s857_s28 = scalar_select %p681_p12, 1, 0 }
  0x14   : > { %s399_s30 = sshll.u32 %s597_s18, 7  ;;  %s398_s5 = sshll.u32 %s686_s29, 3 }
  0x15   : > { %s695_s8 = scalar_lea.hbm %s847_s0, %s399_s30  ;;  %s171_s9 = scalar_lea.vmem [#allocation2], %s398_s5 }
  0x16   : > { %s178_s10 = sshll.u32 %s171_s9, 4  ;;  %p701_p13 = pnand %p429_p10, %p666_p5  ;;  %s705_s10 = int_to_ptr.vmem [resolvable:$true] %s178_s10 }
  0x17   : > { %s168_s12 = scalar_lea.sflag [#allocation3], %s686_s29  ;;  %s467_s13 = scalar_lea.hbm %s695_s8, 128 }
  0x18   : > { %p468_p2 = scmp.ne.s32.totalorder %s695_s8, %s467_s13  ;;  %p469_p3 = pneg %p701_p13 }
  0x19   : > { %s472_s22 = scalar_lea.hbm %s847_s0, 256  ;;  %p473_p5 = scmp.lt.u32.totalorder %s695_s8, %s847_s0 }
  0x1a   : > { %p470_p4 = pnand %p469_p3, %p468_p2  ;;  %p474_p8 = scmp.lt.u32.totalorder %s472_s22, %s467_s13 }
  0x1b   : > { %p476_p9 = scmp.lt.u32.totalorder %s467_s13, %s695_s8 }
  0x1c   : > { %p471_p7 = pneg %p470_p4  ;;  %p475_p10 = por %p474_p8, %p473_p5 }
  0x1e   : > { %p477_p0 = por %p476_p9, %p475_p10 }
  0x20   : > { %p478_p1 = pnand %p477_p0, %p471_p7 }
  0x22   : > { %481 = shalt.err (!%p478_p1)
}
  0x23   : > { %s482_s6 = scalar_lea.vmem %s705_s10, 128  ;;  %s599_s7 = smov [#allocation2]  }
  0x24   : > { %p483_p2 = scmp.ne.s32.totalorder %s705_s10, %s482_s6  ;;  %s487_s9 = sshll.u32 %s599_s7, 4  ;;  %s488_s9 = int_to_ptr.vmem [resolvable:$false] %s487_s9 }
  0x25   : > { %s489_s14 = scalar_lea.vmem %s488_s9, 256  ;;  %p490_p11 = scmp.lt.s32.totalorder %s705_s10, %s488_s9 }
  0x26   : > { %p485_p4 = pnand %p483_p2, %p469_p3  ;;  %p491_p5 = scmp.lt.s32.totalorder %s489_s14, %s482_s6 }
  0x28   : > { %p486_p12 = pneg %p485_p4  ;;  %p492_p8 = por %p491_p5, %p490_p11 }
  0x2a   : > { %p493_p9 = pnand %p492_p8, %p486_p12 }
  0x2c   : > { %496 = shalt.err (!%p493_p9)
}
  0x2d   : > { %421 = dma.hbm_to_vmem [thread:$0]  (!%p701_p13), %s695_s8, 128, %s705_s10, %s168_s12  }
  0x2e   : > { %p859_p0 = scmp.lt.s32.totalorder %s597_s18, 3  ;;  %p860_p1 = scmp.ge.s32.totalorder %s597_s18, 1 }
  0x2f   : > { %s748_s23 = scalar_lea.hbm %s848_s1, %s399_s30  ;;  %s189_s25 = scalar_lea.vmem [#allocation5], %s398_s5 }
  0x30   : > { %p739_p7 = pnand %p860_p1, %p859_p0  ;;  %s196_s6 = sshll.u32 %s189_s25, 4  ;;  %s197_s6 = int_to_ptr.vmem [resolvable:$true] %s196_s6 }
  0x31   : > { %s186_s8 = scalar_lea.sflag [#allocation6], %s686_s29  ;;  %s497_s10 = scalar_lea.hbm %s748_s23, 128 }
  0x32   : > { %s861_s13 = scalar_select %p739_p7, 1, 0 }
  0x33   : > { %p498_p11 = scmp.ne.s32.totalorder %s748_s23, %s497_s10  ;;  %s502_s30 = scalar_lea.hbm %s848_s1, 256 }
  0x34   : > { %p503_p2 = scmp.lt.u32.totalorder %s748_s23, %s848_s1  ;;  %p504_p4 = scmp.lt.u32.totalorder %s502_s30, %s497_s10 }
  0x35   : > { %p500_p12 = pnand %p498_p11, %p469_p3  ;;  %p506_p8 = scmp.lt.u32.totalorder %s497_s10, %s748_s23 }
  0x36   : > { %p505_p5 = por %p504_p4, %p503_p2 }
  0x37   : > { %p501_p10 = pneg %p500_p12 }
  0x38   : > { %p507_p9 = por %p506_p8, %p505_p5 }
  0x3a   : > { %p508_p0 = pnand %p507_p9, %p501_p10 }
  0x3c   : > { %511 = shalt.err (!%p508_p0)
}
  0x3d   : > { %s512_s29 = scalar_lea.vmem %s197_s6, 128  ;;  %s600_s5 = smov [#allocation5]  }
  0x3e   : > { %p513_p1 = scmp.ne.s32.totalorder %s197_s6, %s512_s29  ;;  %s517_s20 = sshll.u32 %s600_s5, 4  ;;  %s518_s20 = int_to_ptr.vmem [resolvable:$false] %s517_s20 }
  0x3f   : > { %s519_s22 = scalar_lea.vmem %s518_s20, 256  ;;  %p520_p6 = scmp.lt.s32.totalorder %s197_s6, %s518_s20 }
  0x40   : > { %p515_p11 = pnand %p513_p1, %p469_p3  ;;  %p521_p7 = scmp.lt.s32.totalorder %s519_s22, %s512_s29 }
  0x42   : > { %p516_p12 = pneg %p515_p11  ;;  %p522_p2 = por %p521_p7, %p520_p6 }
  0x44   : > { %p523_p4 = pnand %p522_p2, %p516_p12 }
  0x46   : > { %526 = shalt.err (!%p523_p4)
}
  0x47   : > { %424 = dma.hbm_to_vmem [thread:$0]  (!%p701_p13), %s748_s23, 128, %s197_s6, %s186_s8  }
  0x48   : > { %p862_p10 = scmp.ne.s32.totalorder %s861_s13, 0 }
  0x49   : > { %s775_s25 = sand.u32 (!%p862_p10), 1, %s589_s16   ;;  %p863_p6 = scmp.ne.s32.totalorder (!%p862_p10), %s855_s26, 0 }
  0x4a   : > { %205 = sbr.rel (%p862_p10) target bundleno = 427 (0x1ab), region = 36  ;;  %s778_s10 = sshll.u32 (!%p862_p10), %s775_s25, 3 }
  0x4b   : > { %s208_s12 = scalar_lea.sflag (!%p862_p10), [#allocation3], %s775_s25  ;;  %s211_s7 = scalar_lea.vmem (!%p862_p10), [#allocation2], %s778_s10 }
  0x51   : > { %572 = dma.done.wait (%p863_p6), %s208_s12, 128  }
  0x52   : > { %574 = vsyncadd (%p863_p6), %s208_s12, 4294967168  ;;  %s217_s11 = scalar_lea.sflag [#allocation6], %s775_s25  ;;  %s220_s13 = scalar_lea.vmem [#allocation5], %s778_s10 }
  0x53   : > { %576 = dma.done.wait (%p863_p6), %s217_s11, 128  }
  0x54   : > { %578 = vsyncadd (%p863_p6), %s217_s11, 4294967168  ;;  %v250_v0 = vld [vmem:[%s211_s7] sm:$0xff]  ;;  %v251_v1 = vld [vmem:[%s220_s13] sm:$0xff]  ;;  %s409_s30 = sshll.u32 %s648_s19, 7  ;;  %s249_s9 = scalar_lea.vmem [#allocation7], %s778_s10 }
  0x55   : > { %v252_v2 = vadd.f32 %v251_v1, %v250_v0  ;;  %v406_v16 = vld [vmem:[%s849_s2] ss:$0 sm:$0xff]  ;;  %s302_s14 = sshll.u32 %s249_s9, 4  ;;  %s803_s20 = scalar_lea.hbm %s851_s4, %s409_s30  ;;  %s805_s14 = int_to_ptr.vmem [resolvable:$true] %s302_s14 }
  0x56   : > { %v407_v18 = vld [vmem:[%s850_s3] ss:$0 sm:$0xff]  ;;  %s289_s22 = scalar_lea.sflag [#allocation4], %s775_s25  ;;  %s527_s12 = scalar_lea.vmem %s805_s14, 128 }
  0x57   : > { %253 = vadd.xlane.f32.xlu0 %v252_v2  ;;  %p528_p13 = scmp.ne.s32.totalorder %s805_s14, %s527_s12  ;;  %p864_p3 = scmp.ne.s32.totalorder %s856_s27, 0 }
  0x58   : > { %s601_s19 = smov [#allocation7]  }
  0x59   : > { %p529_p7 = pnand %p528_p13, %p864_p3  ;;  %s531_s10 = sshll.u32 %s601_s19, 4  ;;  %s532_s10 = int_to_ptr.vmem [resolvable:$false] %s531_s10 }
  0x5a   : > { %s533_s7 = scalar_lea.vmem %s532_s10, 256  ;;  %p534_p8 = scmp.lt.s32.totalorder %s805_s14, %s532_s10 }
  0x5b   : > { %p530_p5 = pneg %p529_p7  ;;  %p535_p9 = scmp.lt.s32.totalorder %s533_s7, %s527_s12 }
  0x5d   : > { %p536_p0 = por %p535_p9, %p534_p8 }
  0x5f   : > { %p537_p1 = pnand %p536_p0, %p530_p5 }
  0xe4   : > { %v254_v3 = vpop.xlane.xlu0 %253 }
  0xe5   : > { %v255_v4 = vmul.f32 0.0078125, %v254_v3 }
  0xe7   : > { %v256_v5 = vsub.f32 %v252_v2, %v255_v4 }
  0xe9   : > { %v257_v6 = vmul.f32 %v256_v5, %v256_v5 }
  0xeb   : > { %258 = vadd.xlane.f32.xlu0 %v257_v6 }
 0x178   : > { %v259_v7 = vpop.xlane.xlu0 %258 }
 0x179   : > { %v260_v8 = vmul.f32 0.007874016, %v259_v7 }
 0x17b   : > { %463 = vrsqrt.f32 %v260_v8  ;;  %vm263_vm0 = vcmp.eq.f32.partialorder %v260_v8, inf  ;;  %v266_v11 = vand.u32 2147483648, %v260_v8  ;;  %vm265_vm1 = vcmp.eq.f32.partialorder %v260_v8, 0.0 }
 0x185   : > { %v464_v9 = vpop.eup %463 }
 0x186   : > { %v262_v10 = vmul.f32 %v464_v9, %v260_v8 }
 0x188   : > { %v264_v12 = vsel %vm263_vm0, %v260_v8, %v262_v10 }
 0x189   : > { %v267_v13 = vsel %vm265_vm1, %v266_v11, %v264_v12 }
 0x18a   : > { %v268_v14 = vadd.f32 1e-06, %v267_v13 }
 0x18c   : > { %465 = vrcp.f32 %v268_v14 }
 0x196   : > { %v466_v15 = vpop.eup %465 }
 0x197   : > { %v271_v17 = vmul.f32 %v466_v15, %v256_v5 }
 0x199   : > { %v278_v19 = vmul.f32 %v406_v16, %v271_v17 }
 0x19b   : > { %v286_v20 = vadd.f32 %v407_v18, %v278_v19 }
 0x19d   : > { %287 = vst [vmem:[%s249_s9] sm:$0xff] %v286_v20 }
 0x19e   : > { %540 = shalt.err (!%p537_p1)
}
 0x19f   : > { %s541_s25 = scalar_lea.hbm %s803_s20, 128  ;;  %s545_s26 = scalar_lea.hbm %s851_s4, 256 }
 0x1a0   : > { %p542_p11 = scmp.ne.s32.totalorder %s803_s20, %s541_s25  ;;  %p546_p4 = scmp.lt.u32.totalorder %s803_s20, %s851_s4 }
 0x1a1   : > { %p547_p10 = scmp.lt.u32.totalorder %s545_s26, %s541_s25  ;;  %p549_p13 = scmp.lt.u32.totalorder %s541_s25, %s803_s20 }
 0x1a2   : > { %p543_p12 = pnand %p542_p11, %p864_p3 }
 0x1a3   : > { %p548_p6 = por %p547_p10, %p546_p4 }
 0x1a4   : > { %p544_p2 = pneg %p543_p12 }
 0x1a5   : > { %p550_p7 = por %p549_p13, %p548_p6 }
 0x1a7   : > { %p551_p5 = pnand %p550_p7, %p544_p2 }
 0x1a9   : > { %554 = shalt.err (!%p551_p5)
}
 0x1aa   : > { %416 = dma.vmem_to_hbm [thread:$0]  (%p864_p3), %s805_s14, 128, %s803_s20, %s289_s22  }
 0x1ab PF: > { %s314_s8 = sand.u32 1, %s585_s15   ;;  %p865_p8 = scmp.ne.s32.totalorder %s857_s28, 0 }
 0x1ac   : > { %p866_p9 = scmp.ge.s32.totalorder %s597_s18, 2  ;;  %s315_s30 = scalar_lea.sflag [#allocation4], %s314_s8 }
 0x1ae   : > { %p426_p0 = pnand %p866_p9, %p865_p8 }
 0x1b0   : > { %580 = dma.done.wait (!%p426_p0), %s315_s30, 128  }
 0x1b1   : > { %582 = vsyncadd (!%p426_p0), %s315_s30, 4294967168  ;;  %p20_p1 = scmp.ge.s32.totalorder %s652_s21, 4   ;;  %s867_s15 = smov %s589_s16 }
 0x1b2   : > { %s868_s16 = smov %s593_s17  ;;  %s869_s17 = smov %s664_s24 }
 0x1b3   : > { %s870_s18 = smov %s652_s21  ;;  %22 = sbr.rel (!%p20_p1) target bundleno = 7 (0x7), region = 94 }
 0x1ba   :  { %320 = vsyncpa [#allocation3], 1 }
 0x1bb   :  { %322 = vsyncpa [#allocation3 + $0x1], 1 }
 0x1bc   :  { %323 = vsyncpa [#allocation6], 1 }
 0x1bd   :  { %325 = vsyncpa [#allocation6 + $0x1], 1 }
 0x1be   :  { %326 = vsyncpa [#allocation4], 1 }
 0x1bf   :  { %328 = vsyncpa [#allocation4 + $0x1], 1 }

</bundles_post_ra>
